<compile_context>
chip_gen: v6e
topology: v6e:2x2x1
jax: 0.10.0
libtpu: 0.0.40
codegen_flags: <defaults>
</compile_context>

<pallas_src>
import jax
import jax.numpy as jnp
from jax.experimental import pallas as pl
from jax.experimental.pallas import tpu as pltpu


def _gavg_pool_kernel(x_ref, p_ref, o_ref):
    # x_ref: (row_block, K), p_ref: (K, 128) constant pooling matrix, o_ref: (row_block, 128)
    x = x_ref[...]
    if x.dtype != p_ref.dtype:
        x = x.astype(p_ref.dtype)
    acc = jnp.dot(x, p_ref[...], preferred_element_type=jnp.float32)  # MXU, f32 accumulate
    o_ref[...] = acc.astype(o_ref.dtype)


def _sublane_quantum(dtype):
    # Sub-32-bit dtypes pack along sublanes: 8 rows for f32, 16 for bf16, 32 for int8/fp8.
    itemsize = jnp.dtype(dtype).itemsize
    return {4: 8, 2: 16, 1: 32}.get(itemsize, 8)


def _default_block_bytes():
    # ~8 MiB of input per grid step on v7x (HBM ~3.2 TB/s per core), ~4 MiB on v5e/v6e.
    try:
        kind = jax.devices()[0].device_kind.lower()
    except Exception:
        return 4 * 1024 * 1024
    return 8 * 1024 * 1024 if "v7" in kind else 4 * 1024 * 1024


def _pick_row_block(rows, sub, row_bytes, target_block_bytes, min_steps=8):
    """Rows per block: multiple of the sublane quantum, sized to target_block_bytes,
    capped so large inputs get a multi-step grid (megacore sharding + pipelining)."""
    if rows <= sub:
        return rows
    cap = max(sub, target_block_bytes // max(row_bytes, 1))
    # Keep >= min_steps grid steps for big tensors, but never shrink blocks below ~256 KiB.
    min_rows = max(sub, (256 * 1024) // max(row_bytes, 1))
    cap = min(cap, max(rows // min_steps, min_rows), rows)
    return max((cap // sub) * sub, sub)


def g_avg_pool2d(x, g_input="C4", target_block_bytes=None):
    """GAvgPool2D forward. x: [N, C, H, W] -> [N, C, H, W // scale]."""
    if g_input == "C4":
        scale = 4
    elif g_input == "D4":
        scale = 8
    else:
        scale = 1

    N, C, H, W = x.shape
    if scale == 1:
        # Mean over groups of size 1 is the identity; skip the kernel entirely.
        return x
    assert W % scale == 0, "last dim must be divisible by the group scale"
    # TODO(synk): integer dtypes would need round-to-nearest semantics; torch.mean
    # rejects integer inputs, so only floating dtypes are expected here.

    itemsize = jnp.dtype(x.dtype).itemsize
    sub = _sublane_quantum(x.dtype)
    if target_block_bytes is None:
        target_block_bytes = _default_block_bytes()

    G = 128                  # output lanes per row (unmasked, lane-dense stores)
    K = G * scale            # input lanes per row
    total = N * C * H * W

    # Flat [rows, K] view. Padding is only materialized when total is not a multiple
    # of K (or the tensor is tiny); W % scale == 0 keeps every pooling group inside
    # the valid region, so padded lanes only feed padded (discarded) outputs.
    rows = max(pl.cdiv(total, K), sub)
    padded_total = rows * K
    xf = x.reshape(-1)
    if padded_total != total:
        xf = jnp.pad(xf, (0, padded_total - total))
    x2 = xf.reshape(rows, K)

    row_block = _pick_row_block(rows, sub, K * itemsize, target_block_bytes)
    grid = (pl.cdiv(rows, row_block),)

    # Constant block-pooling matrix: P[i, j] = 1/scale iff i // scale == j.
    # 1/4 and 1/8 are exact in bf16/f32, so this is numerically a plain group mean.
    compute_dtype = jnp.bfloat16 if x.dtype == jnp.bfloat16 else jnp.float32
    groups = jnp.arange(K, dtype=jnp.int32) // scale
    p = jnp.where(groups[:, None] == jnp.arange(G, dtype=jnp.int32)[None, :],
                  jnp.asarray(1.0 / scale, compute_dtype),
                  jnp.asarray(0.0, compute_dtype))

    # VMEM budget: double-buffered input + output blocks, resident pooling matrix,
    # possible cast temp, plus headroom. Clamped to stay under v7x's 64 MiB VMEM.
    in_block = row_block * K * itemsize
    out_block = row_block * G * itemsize
    p_bytes = K * G * jnp.dtype(compute_dtype).itemsize
    cast_tmp = row_block * K * 4 if x.dtype != compute_dtype else 0
    vmem_limit = 2 * in_block + 2 * out_block + p_bytes + cast_tmp + 6 * 1024 * 1024
    vmem_limit = int(min(max(vmem_limit, 16 * 1024 * 1024), 64 * 1024 * 1024))

    out2 = pl.pallas_call(
        _gavg_pool_kernel,
        out_shape=jax.ShapeDtypeStruct((rows, G), x.dtype),
        grid=grid,
        in_specs=[
            pl.BlockSpec((row_block, K), lambda i: (i, 0)),
            pl.BlockSpec((K, G), lambda i: (0, 0)),    # fetched once, stays resident
        ],
        out_specs=pl.BlockSpec((row_block, G), lambda i: (i, 0)),
        compiler_params=pltpu.CompilerParams(
            dimension_semantics=("parallel",),
            vmem_limit_bytes=vmem_limit,
        ),
    )(x2, p)

    out_flat = out2.reshape(-1)
    if padded_total != total:
        out_flat = out_flat[: total // scale]
    return out_flat.reshape(N, C, H, W // scale)


if __name__ == "__main__":
    key = jax.random.PRNGKey(0)

    # Small NCHW input consistent with the module: batch=2, channels=4, spatial 16x16.
    x = jax.random.normal(key, (2, 4, 16, 16), dtype=jnp.float32)
    y = jax.block_until_ready(g_avg_pool2d(x, g_input="C4"))
    N, C, H, W = x.shape
    y_ref = jnp.mean(x.reshape(-1, C, H, W // 4, 4), axis=-1)
    assert y.shape == (N, C, H, W // 4)
    assert jnp.allclose(y, y_ref, atol=1e-5, rtol=1e-5), "C4 mismatch"

    # D4 (scale=8) path.
    x8 = jax.random.normal(jax.random.PRNGKey(1), (2, 4, 16, 32), dtype=jnp.float32)
    y8 = jax.block_until_ready(g_avg_pool2d(x8, g_input="D4"))
    y8_ref = jnp.mean(x8.reshape(-1, 4, 16, 4, 8), axis=-1)
    assert y8.shape == (2, 4, 16, 4)
    assert jnp.allclose(y8, y8_ref, atol=1e-5, rtol=1e-5), "D4 mismatch"

    # Larger, exactly-divisible case (no-padding path, multi-row blocks).
    xl = jax.random.normal(jax.random.PRNGKey(2), (2, 8, 16, 64), dtype=jnp.float32)
    yl = jax.block_until_ready(g_avg_pool2d(xl, g_input="C4"))
    yl_ref = jnp.mean(xl.reshape(-1, 8, 16, 16, 4), axis=-1)
    assert yl.shape == (2, 8, 16, 16)
    assert jnp.allclose(yl, yl_ref, atol=1e-5, rtol=1e-5), "large C4 mismatch"

    # Awkward shape (exercises the flat-padding fallback + tail slice).
    xo = jax.random.normal(jax.random.PRNGKey(3), (2, 3, 5, 12), dtype=jnp.float32)
    yo = jax.block_until_ready(g_avg_pool2d(xo, g_input="C4"))
    yo_ref = jnp.mean(xo.reshape(-1, 3, 5, 3, 4), axis=-1)
    assert yo.shape == (2, 3, 5, 3)
    assert jnp.allclose(yo, yo_ref, atol=1e-5, rtol=1e-5), "padded C4 mismatch"

    print("KERNEL_OK")
</pallas_src>

<mosaic_0001>
module attributes {stable_mosaic.version = 11 : i64} {
  func.func @_gavg_pool_kernel(%arg0: i32, %arg1: memref<8x512xf32, #tpu.memory_space<vmem>>, %arg2: memref<512x128xf32, #tpu.memory_space<vmem>>, %arg3: memref<8x128xf32, #tpu.memory_space<vmem>>) attributes {dimension_semantics = [#tpu.dimension_semantics<parallel>], iteration_bounds = array<i64: 1>, scalar_prefetch = 0 : i64, scratch_operands = 0 : i64, tpu.core_type = #tpu.core_type<tc>, window_params = [{transform_indices = @transform_0, window_bounds = array<i64: 8, 512>}, {pipeline_mode = #tpu.pipeline_mode<synchronous>, transform_indices = @transform_1, window_bounds = array<i64: 512, 128>}, {transform_indices = @transform_2, window_bounds = array<i64: 8, 128>}]} {
    %c0 = arith.constant 0 : index
    %c0_0 = arith.constant 0 : index
    %0 = vector.load %arg1[%c0, %c0_0] : memref<8x512xf32, #tpu.memory_space<vmem>>, vector<8x512xf32>
    %c0_1 = arith.constant 0 : index
    %c0_2 = arith.constant 0 : index
    %1 = vector.load %arg2[%c0_1, %c0_2] : memref<512x128xf32, #tpu.memory_space<vmem>>, vector<512x128xf32>
    %cst = arith.constant dense<0.000000e+00> : vector<8x128xf32>
    %2 = tpu.matmul %0, %1, %cst {dimension_numbers = #tpu.dot_dimension_numbers<[1], [0], [0], [1], [0, 0, 1, 1], [], []>} : vector<8x512xf32>, vector<512x128xf32>, vector<8x128xf32> -> vector<8x128xf32>
    %c0_3 = arith.constant 0 : index
    %c0_4 = arith.constant 0 : index
    %3 = vector.load %arg3[%c0_3, %c0_4] : memref<8x128xf32, #tpu.memory_space<vmem>>, vector<8x128xf32>
    tpu.vector_store %arg3[%c0_3, %c0_4], %2 {strides = array<i32>} : memref<8x128xf32, #tpu.memory_space<vmem>>, vector<8x128xf32>,
    return
  }
  func.func @transform_0(%arg0: i32) -> (i32, i32) {
    %c0_i32 = arith.constant 0 : i32
    %c0_i32_0 = arith.constant 0 : i32
    return %arg0, %c0_i32 : i32, i32
  }
  func.func @transform_1(%arg0: i32) -> (i32, i32) {
    %c0_i32 = arith.constant 0 : i32
    %c0_i32_0 = arith.constant 0 : i32
    %c0_i32_1 = arith.constant 0 : i32
    return %c0_i32, %c0_i32_0 : i32, i32
  }
  func.func @transform_2(%arg0: i32) -> (i32, i32) {
    %c0_i32 = arith.constant 0 : i32
    %c0_i32_0 = arith.constant 0 : i32
    return %arg0, %c0_i32 : i32, i32
  }
}

</mosaic_0001>

<bundles_post_ra>
// kernel: tpu_custom_call.1
= control target key start
LH: loop header
LB: loop body
LE: loop exit
PB: predicated region body
PF: predicated region fallthrough
CT: control target
= control target key end

     0   :  { %7 = vsyncpa [#allocation3], 0  ;;  %s433_s0 = inlined_call_operand.hbm [shape: f32[8,512], index: 0, kind: input, shape index: {}]   ;;  %s434_s1 = inlined_call_operand.hbm [shape: f32[512,128], index: 1, kind: input, shape index: {}]   ;;  %s435_s2 = inlined_call_operand.hbm [shape: f32[8,128], index: 2, kind: output, shape index: {}]  }
   0x1   :  { %8 = vsyncpa [#allocation6], 0 }
   0x2   :  { %9 = vsyncpa [#allocation4], 0  ;;  %s404_s9 = smov [#allocation2]   ;;  %s405_s11 = smov [#allocation5]  }
   0x3   :  { %s16_s10 = sshll.u32 %s404_s9, 4  ;;  %s25_s12 = sshll.u32 %s405_s11, 4  ;;  %s17_s10 = int_to_ptr.vmem [resolvable:$true] %s16_s10  ;;  %s26_s12 = int_to_ptr.vmem [resolvable:$true] %s25_s12 }
   0x4   :  { %s346_s13 = scalar_lea.vmem %s17_s10, 512  ;;  %p351_p1 = scmp.lt.s32.totalorder %s17_s10, %s17_s10 }
   0x5   :  { %p347_p0 = scmp.ne.s32.totalorder %s17_s10, %s346_s13  ;;  %p352_p2 = scmp.lt.s32.totalorder %s346_s13, %s346_s13 }
   0x7   :  { %p353_p3 = por %p352_p2, %p351_p1 }
   0x9   :  { %p354_p4 = pnand %p353_p3, %p347_p0 }
   0xb   :  { %357 = shalt.err (!%p354_p4)
}
   0xc   :  { %19 = dma.hbm_to_vmem [thread:$0]  %s433_s0, 512, %s17_s10, [#allocation3]  }
   0xd   :  { %s366_s16 = scalar_lea.vmem %s26_s12, 8192  ;;  %p371_p6 = scmp.lt.s32.totalorder %s26_s12, %s26_s12 }
   0xe   :  { %p367_p5 = scmp.ne.s32.totalorder %s26_s12, %s366_s16  ;;  %p372_p7 = scmp.lt.s32.totalorder %s366_s16, %s366_s16 }
  0x10   :  { %p373_p8 = por %p372_p7, %p371_p6 }
  0x12   :  { %p374_p9 = pnand %p373_p8, %p367_p5 }
  0x14   :  { %377 = shalt.err (!%p374_p9)
}
  0x15   :  { %s406_s17 = smov 128   ;;  %s407_s18 = smov 8  }
  0x16   :  { %31 = dma.hbm_to_vmem [thread:$0]  %s434_s1, 8192, %s26_s12, [#allocation6], %s406_s17, %s406_s17, %s407_s18  }
  0x17   :  { %398 = dma.done.wait [#allocation3], 512  }
  0x18   :  { %399 = vsyncadd [#allocation3], 4294966784 }
  0x19   :  { %400 = dma.done.wait [#allocation6], 8192  }
  0x1a   :  { %401 = vsyncadd [#allocation6], 4294959104  ;;  %v73_v0 = vld [vmem:[#allocation5 + $0xf8] sm:$0xff]  ;;  %v72_v4 = vld [vmem:[#allocation5 + $0xf0] sm:$0xff]  ;;  %s408_s0 = smov [#allocation7]  }
  0x1b   :  { %v105_v1 = vld [vmem:[#allocation5 + $0x1f8] sm:$0xff]  ;;  %263 = vmatprep.subr.mxu0 %v73_v0  ;;  %v104_v5 = vld [vmem:[#allocation5 + $0x1f0] sm:$0xff]  ;;  %v71_v8 = vld [vmem:[#allocation5 + $0xe8] sm:$0xff]  ;;  %s253_s1 = sshll.u32 %s408_s0, 4  ;;  %s254_s1 = int_to_ptr.vmem [resolvable:$true] %s253_s1 }
  0x1c   :  { %v57_v2 = vld [vmem:[#allocation5 + $0x78] sm:$0xff]  ;;  %298 = vmatprep.subr.mxu1 %v105_v1  ;;  %v56_v6 = vld [vmem:[#allocation5 + $0x70] sm:$0xff]  ;;  %v103_v9 = vld [vmem:[#allocation5 + $0x1e8] sm:$0xff]  ;;  %s378_s21 = scalar_lea.vmem %s254_s1, 128  ;;  %p383_p11 = scmp.lt.s32.totalorder %s254_s1, %s254_s1 }
  0x1d   :  { %v89_v3 = vld [vmem:[#allocation5 + $0x178] sm:$0xff]  ;;  %264 = vmatpush3.msra.mxu0 %v57_v2  ;;  %v88_v7 = vld [vmem:[#allocation5 + $0x170] sm:$0xff]  ;;  %v55_v10 = vld [vmem:[#allocation5 + $0x68] sm:$0xff]  ;;  %p379_p10 = scmp.ne.s32.totalorder %s254_s1, %s378_s21  ;;  %p384_p12 = scmp.lt.s32.totalorder %s378_s21, %s378_s21 }
  0x1e   :  { %299 = vmatpush3.msra.mxu1 %v89_v3  ;;  %265 = vmatprep.subr.mxu0 %v72_v4  ;;  %v87_v11 = vld [vmem:[#allocation5 + $0x168] sm:$0xff]  ;;  %v70_v12 = vld [vmem:[#allocation5 + $0xe0] sm:$0xff]  ;;  %v69_v16 = vld [vmem:[#allocation5 + $0xd8] sm:$0xff] }
  0x1f   :  { %300 = vmatprep.subr.mxu1 %v104_v5  ;;  %266 = vmatpush3.msra.mxu0 %v56_v6  ;;  %v102_v13 = vld [vmem:[#allocation5 + $0x1e0] sm:$0xff]  ;;  %v101_v17 = vld [vmem:[#allocation5 + $0x1d8] sm:$0xff]  ;;  %v68_v20 = vld [vmem:[#allocation5 + $0xd0] sm:$0xff]  ;;  %p385_p13 = por %p384_p12, %p383_p11 }
  0x20   :  { %301 = vmatpush3.msra.mxu1 %v88_v7  ;;  %267 = vmatprep.subr.mxu0 %v71_v8  ;;  %v54_v14 = vld [vmem:[#allocation5 + $0x60] sm:$0xff]  ;;  %v53_v18 = vld [vmem:[#allocation5 + $0x58] sm:$0xff]  ;;  %v100_v21 = vld [vmem:[#allocation5 + $0x1d0] sm:$0xff] }
  0x21   :  { %302 = vmatprep.subr.mxu1 %v103_v9  ;;  %v86_v15 = vld [vmem:[#allocation5 + $0x160] sm:$0xff]  ;;  %268 = vmatpush3.msra.mxu0 %v55_v10  ;;  %v85_v19 = vld [vmem:[#allocation5 + $0x158] sm:$0xff]  ;;  %v52_v22 = vld [vmem:[#allocation5 + $0x50] sm:$0xff]  ;;  %p386_p0 = pnand %p385_p13, %p379_p10 }
  0x22   :  { %303 = vmatpush3.msra.mxu1 %v87_v11  ;;  %269 = vmatprep.subr.mxu0 %v70_v12  ;;  %v84_v23 = vld [vmem:[#allocation5 + $0x150] sm:$0xff]  ;;  %v67_v24 = vld [vmem:[#allocation5 + $0xc8] sm:$0xff]  ;;  %v66_v28 = vld [vmem:[#allocation5 + $0xc0] sm:$0xff] }
  0x23   :  { %304 = vmatprep.subr.mxu1 %v102_v13  ;;  %270 = vmatpush3.msra.mxu0 %v54_v14  ;;  %v99_v25 = vld [vmem:[#allocation5 + $0x1c8] sm:$0xff]  ;;  %v98_v29 = vld [vmem:[#allocation5 + $0x1c0] sm:$0xff]  ;;  %v65_v32 = vld [vmem:[#allocation5 + $0xb8] sm:$0xff] }
  0x24   :  { %305 = vmatpush3.msra.mxu1 %v86_v15  ;;  %271 = vmatprep.subr.mxu0 %v69_v16  ;;  %v51_v26 = vld [vmem:[#allocation5 + $0x48] sm:$0xff]  ;;  %v50_v30 = vld [vmem:[#allocation5 + $0x40] sm:$0xff]  ;;  %v97_v33 = vld [vmem:[#allocation5 + $0x1b8] sm:$0xff] }
  0x25   :  { %306 = vmatprep.subr.mxu1 %v101_v17  ;;  %272 = vmatpush3.msra.mxu0 %v53_v18  ;;  %v83_v27 = vld [vmem:[#allocation5 + $0x148] sm:$0xff]  ;;  %v82_v31 = vld [vmem:[#allocation5 + $0x140] sm:$0xff]  ;;  %v49_v34 = vld [vmem:[#allocation5 + $0x38] sm:$0xff] }
  0x26   :  { %307 = vmatpush3.msra.mxu1 %v85_v19  ;;  %273 = vmatprep.subr.mxu0 %v68_v20  ;;  %v81_v35 = vld [vmem:[#allocation5 + $0x138] sm:$0xff]  ;;  %v64_v36 = vld [vmem:[#allocation5 + $0xb0] sm:$0xff]  ;;  %v63_v40 = vld [vmem:[#allocation5 + $0xa8] sm:$0xff] }
  0x27   :  { %308 = vmatprep.subr.mxu1 %v100_v21  ;;  %274 = vmatpush3.msra.mxu0 %v52_v22  ;;  %v96_v37 = vld [vmem:[#allocation5 + $0x1b0] sm:$0xff]  ;;  %v95_v41 = vld [vmem:[#allocation5 + $0x1a8] sm:$0xff]  ;;  %v62_v44 = vld [vmem:[#allocation5 + $0xa0] sm:$0xff] }
  0x28   :  { %309 = vmatpush3.msra.mxu1 %v84_v23  ;;  %275 = vmatprep.subr.mxu0 %v67_v24  ;;  %v48_v38 = vld [vmem:[#allocation5 + $0x30] sm:$0xff]  ;;  %v47_v42 = vld [vmem:[#allocation5 + $0x28] sm:$0xff]  ;;  %v94_v45 = vld [vmem:[#allocation5 + $0x1a0] sm:$0xff] }
  0x29   :  { %310 = vmatprep.subr.mxu1 %v99_v25  ;;  %276 = vmatpush3.msra.mxu0 %v51_v26  ;;  %v80_v39 = vld [vmem:[#allocation5 + $0x130] sm:$0xff]  ;;  %v79_v43 = vld [vmem:[#allocation5 + $0x128] sm:$0xff]  ;;  %v46_v46 = vld [vmem:[#allocation5 + $0x20] sm:$0xff] }
  0x2a   :  { %311 = vmatpush3.msra.mxu1 %v83_v27  ;;  %277 = vmatprep.subr.mxu0 %v66_v28  ;;  %v78_v47 = vld [vmem:[#allocation5 + $0x120] sm:$0xff]  ;;  %v61_v48 = vld [vmem:[#allocation5 + $0x98] sm:$0xff]  ;;  %v60_v52 = vld [vmem:[#allocation5 + $0x90] sm:$0xff] }
  0x2b   :  { %312 = vmatprep.subr.mxu1 %v98_v29  ;;  %278 = vmatpush3.msra.mxu0 %v50_v30  ;;  %v93_v49 = vld [vmem:[#allocation5 + $0x198] sm:$0xff]  ;;  %v92_v53 = vld [vmem:[#allocation5 + $0x190] sm:$0xff]  ;;  %v59_v56 = vld [vmem:[#allocation5 + $0x88] sm:$0xff] }
  0x2c   :  { %313 = vmatpush3.msra.mxu1 %v82_v31  ;;  %279 = vmatprep.subr.mxu0 %v65_v32  ;;  %v45_v50 = vld [vmem:[#allocation5 + $0x18] sm:$0xff]  ;;  %v44_v54 = vld [vmem:[#allocation5 + $0x10] sm:$0xff]  ;;  %v91_v57 = vld [vmem:[#allocation5 + $0x188] sm:$0xff] }
  0x2d   :  { %314 = vmatprep.subr.mxu1 %v97_v33  ;;  %280 = vmatpush3.msra.mxu0 %v49_v34  ;;  %v77_v51 = vld [vmem:[#allocation5 + $0x118] sm:$0xff]  ;;  %v76_v55 = vld [vmem:[#allocation5 + $0x110] sm:$0xff]  ;;  %v43_v58 = vld [vmem:[#allocation5 + $0x8] sm:$0xff] }
  0x2e   :  { %315 = vmatpush3.msra.mxu1 %v81_v35  ;;  %281 = vmatprep.subr.mxu0 %v64_v36  ;;  %v75_v59 = vld [vmem:[#allocation5 + $0x108] sm:$0xff]  ;;  %v58_v60 = vld [vmem:[#allocation5 + $0x80] sm:$0xff]  ;;  %v41_v1 = vld [vmem:[#allocation2 + $0x18] sm:$0xff] }
  0x2f   :  { %316 = vmatprep.subr.mxu1 %v96_v37  ;;  %282 = vmatpush3.msra.mxu0 %v48_v38  ;;  %v90_v61 = vld [vmem:[#allocation5 + $0x180] sm:$0xff]  ;;  %v39_v63 = vld [vmem:[#allocation2 + $0x8] sm:$0xff]  ;;  %v40_v3 = vld [vmem:[#allocation2 + $0x10] sm:$0xff] }
  0x30   :  { %317 = vmatpush3.msra.mxu1 %v80_v39  ;;  %283 = vmatprep.subr.mxu0 %v63_v40  ;;  %v42_v62 = vld [vmem:[#allocation5] sm:$0xff] }
  0x31   :  { %318 = vmatprep.subr.mxu1 %v95_v41  ;;  %284 = vmatpush3.msra.mxu0 %v47_v42  ;;  %v74_v0 = vld [vmem:[#allocation5 + $0x100] sm:$0xff] }
  0x32   :  { %319 = vmatpush3.msra.mxu1 %v79_v43  ;;  %285 = vmatprep.subr.mxu0 %v62_v44  ;;  %v38_v2 = vld [vmem:[#allocation2] sm:$0xff] }
  0x33   :  { %320 = vmatprep.subr.mxu1 %v94_v45  ;;  %286 = vmatpush3.msra.mxu0 %v46_v46 }
  0x34   :  { %321 = vmatpush3.msra.mxu1 %v78_v47  ;;  %287 = vmatprep.subr.mxu0 %v61_v48 }
  0x35   :  { %322 = vmatprep.subr.mxu1 %v93_v49  ;;  %288 = vmatpush3.msra.mxu0 %v45_v50 }
  0x36   :  { %323 = vmatpush3.msra.mxu1 %v77_v51  ;;  %289 = vmatprep.subr.mxu0 %v60_v52 }
  0x37   :  { %324 = vmatprep.subr.mxu1 %v92_v53  ;;  %290 = vmatpush3.msra.mxu0 %v44_v54 }
  0x38   :  { %325 = vmatpush3.msra.mxu1 %v76_v55  ;;  %291 = vmatprep.subr.mxu0 %v59_v56 }
  0x39   :  { %326 = vmatprep.subr.mxu1 %v91_v57  ;;  %292 = vmatpush3.msra.mxu0 %v43_v58 }
  0x3a   :  { %327 = vmatpush3.msra.mxu1 %v75_v59  ;;  %293 = vmatprep.subr.mxu0 %v58_v60 }
  0x3b   :  { %328 = vmatprep.subr.mxu1 %v90_v61  ;;  %294 = vmatpush3.msra.mxu0 %v42_v62 }
  0x3c   :  { %170 = vmatprep.mubr.f32.mxu0 %v39_v63  ;;  %329 = vmatpush3.msra.mxu1 %v74_v0 }
  0x3d   :  { %240 = vmatprep.mubr.f32.mxu1 %v41_v1  ;;  %171 = vmatmul.mubr.f32.vlgmr.msra.gmra.mxu0 %v38_v2 }
  0x3e   :  { %241 = vmatmul.mubr.f32.vlgmr.msra.gmra.mxu1 %v40_v3 }
  0xfd   :  { %v295_v4 = vpop.f32.mrf.mxu0 }
  0xfe   :  { %v330_v5 = vpop.f32.mrf.mxu1 }
  0xff   :  { %v296_v6 = vpop.f32.mrf.mxu0 }
 0x100   :  { %v331_v7 = vpop.f32.mrf.mxu1  ;;  %v297_v8 = vadd.f32 %v296_v6, %v295_v4 }
 0x101   :  { %v332_v9 = vadd.f32 %v331_v7, %v330_v5 }
 0x103   :  { %v243_v10 = vadd.f32 %v332_v9, %v297_v8 }
 0x105   :  { %246 = vst [vmem:[#allocation7] sm:$0xff] %v243_v10 }
 0x106   :  { %389 = shalt.err (!%p386_p0)
}
 0x107   :  { %256 = dma.vmem_to_hbm [thread:$0]  %s254_s1, 128, %s435_s2, [#allocation4]  }
 0x108   :  { %402 = dma.done.wait [#allocation4], 128  }
 0x109   :  { %403 = vsyncadd [#allocation4], 4294967168 }
 0x10a   :  { %260 = vsyncpa [#allocation3], 1 }
 0x10b   :  { %261 = vsyncpa [#allocation6], 1 }
 0x10c   :  { %262 = vsyncpa [#allocation4], 1 }

</bundles_post_ra>
